<compile_context>
chip_gen: v5e
topology: v5e:2x2
jax: 0.10.0
libtpu: 0.0.40
codegen_flags: <defaults>
</compile_context>

<pallas_src>
import functools

import jax
import jax.numpy as jnp
from jax import lax
from jax.experimental import pallas as pl
from jax.experimental.pallas import tpu as pltpu


def _segment_classifier_kernel(x_ref, w_ref, b_ref, o_ref, *, cin, cout):
    """Fused AvgPool1d(K, stride=K) -> Conv1d(1x1) -> Conv1d(1x1).

    x_ref : (1, Cin, T, K)  one batch element, T pooling windows of length K
                            (K on the lane axis -> lane-dense streaming loads)
    w_ref : (Cout, Cin)     fused weight  w2 @ w1 / K      (SMEM, scalar reads)
    b_ref : (Cout,)         fused bias    w2 @ b1 + b2     (SMEM, scalar reads)
    o_ref : (1, Cout, T)    segments on the lane axis
    """
    x = x_ref[0]                                    # (Cin, T, K)
    # Window SUM (1/K is folded into w): K//128 vreg adds (VPU) + one
    # cross-lane reduce (XLU) per (channel, segment) row.
    pooled = jnp.sum(x, axis=-1)                    # (Cin, T), T lane-dense
    # Channel contraction depth is only 5-6: explicit VPU broadcast-FMA with
    # SMEM scalar weights beats a <3%-utilized MXU push/pop on the serial
    # per-tile tail.  NOTE: this mixes only channels (sublanes), never
    # segments (lanes), so a partial last segment tile stays correct (Pallas
    # drops the padded output columns on writeback).
    rows = []
    for o in range(cout):
        acc = pooled[0:1, :] * w_ref[o, 0]
        for c in range(1, cin):
            acc = acc + pooled[c:c + 1, :] * w_ref[o, c]
        rows.append(acc + b_ref[o])
    y = jnp.concatenate(rows, axis=0)               # (Cout, T)
    o_ref[0] = y.astype(o_ref.dtype)


def _vmem_capacity_bytes():
    """Per-TensorCore VMEM, with a conservative (v7x) fallback."""
    try:
        return int(pltpu.get_tpu_info().vmem_capacity_bytes)
    except Exception:
        return 64 << 20


def _choose_seg_tile(n_seg, n_batch, cin, k, itemsize, per_buffer_budget):
    """Segments per grid step (multiple of 128 whenever we split).

    Goals (in order): respect the per-buffer VMEM budget; give each batch
    element >=2 pipelined grid steps once its block exceeds a few MiB; make
    sure the parallel grid has >=2 cells even for batch==1 (v7x megacore);
    keep the output block's last (lane) dim unmasked.
    """
    bytes_per_seg = cin * k * itemsize
    t_cap = max(128, (per_buffer_budget // bytes_per_seg) // 128 * 128)
    # TODO(synk): if even a 128-segment block (cin*128*K*itemsize) blows the
    # VMEM budget (extreme K, esp. on v7x's 64 MiB VMEM), add an innermost
    # "arbitrary" grid axis over the pool window with a f32 VMEM accumulator.

    if n_seg <= 128:
        return n_seg                 # can't split without masking output lanes

    full_bytes = bytes_per_seg * n_seg
    if full_bytes <= (4 << 20):
        if n_batch >= 2:
            return n_seg             # tiny blocks; batch axis already pipelines
        target_steps = 2             # batch==1: split so both v7x cores work
    elif full_bytes <= (16 << 20):
        target_steps = 2
    else:
        target_steps = 4

    t = pl.cdiv(pl.cdiv(n_seg, target_steps), 128) * 128
    t = max(128, min(t, t_cap, n_seg))
    return t


def segment_classifier_forward(z, params, avgpool_kernel):
    """z: (N, Cin, L) in PyTorch NCL layout -> (N, Cout, L // avgpool_kernel)."""
    n, cin, l = z.shape
    k = avgpool_kernel
    n_seg = l // k                                   # AvgPool1d floor semantics
    # When L % K == 0 the reshape is a free metadata change.  When L % K != 0
    # the slice materializes one extra HBM copy of z (perf only, not
    # correctness).  TODO(synk): express the truncation via the BlockSpec to
    # avoid that extra pass for the non-divisible case.
    x = z if l == n_seg * k else z[:, :, : n_seg * k]
    x = x.reshape(n, cin, n_seg, k)

    w1 = params["w1"].astype(jnp.float32)
    b1 = params["b1"].astype(jnp.float32)
    w2 = params["w2"].astype(jnp.float32)
    b2 = params["b2"].astype(jnp.float32)
    cout = w2.shape[0]

    # Exact algebraic fusion (no activation between the convs): one channel
    # matmul + bias instead of two, with the 1/K pooling scale folded in.
    w_f = jnp.dot(w2, w1, precision=lax.Precision.HIGHEST) * (1.0 / k)   # (Cout, Cin)
    b_f = (jnp.dot(w2, b1, precision=lax.Precision.HIGHEST) + b2).reshape(-1)  # (Cout,)

    # Generation-aware VMEM budgeting: v5e/v6e have 128 MiB VMEM per core,
    # v7x only 64 MiB -> smaller tiles and no extra pipeline depth there.
    big_vmem = _vmem_capacity_bytes() >= (100 << 20)
    per_buffer_budget = (12 << 20) if big_vmem else (8 << 20)
    vmem_limit = (64 << 20) if big_vmem else (32 << 20)

    itemsize = jnp.dtype(x.dtype).itemsize
    t = _choose_seg_tile(n_seg, n, cin, k, itemsize, per_buffer_budget)
    seg_steps = pl.cdiv(n_seg, t)
    grid = (n, seg_steps)

    in_block = (1, cin, t, k)
    in_idx = lambda b, s: (b, 0, s, 0)
    x_spec = pl.BlockSpec(in_block, in_idx)
    if big_vmem and n * seg_steps >= 3:
        # Spend spare VMEM on pipeline depth (hides DMA issue gaps at tile
        # boundaries on this pure HBM-read-bound stream).  Fall back silently
        # if this jax build lacks pipeline_mode / Buffered.
        try:
            x_spec = pl.BlockSpec(in_block, in_idx, pipeline_mode=pl.Buffered(3))
        except (TypeError, AttributeError):
            pass

    smem_spec = pl.BlockSpec(memory_space=pltpu.MemorySpace.SMEM)

    kernel = functools.partial(_segment_classifier_kernel, cin=cin, cout=cout)
    out = pl.pallas_call(
        kernel,
        out_shape=jax.ShapeDtypeStruct((n, cout, n_seg), jnp.float32),
        grid=grid,
        in_specs=[
            x_spec,        # pooled-window input, (1, Cin, T, K)
            smem_spec,     # fused weight (Cout, Cin) -> scalar broadcasts
            smem_spec,     # fused bias   (Cout,)
        ],
        out_specs=pl.BlockSpec((1, cout, t), lambda b, s: (b, 0, s)),
        compiler_params=pltpu.CompilerParams(
            dimension_semantics=("parallel", "parallel"),
            vmem_limit_bytes=vmem_limit,
        ),
    )(x, w_f, b_f)
    return out


def init_params(key, num_classes):
    cin = num_classes + 1
    cout = num_classes
    k1, k2, k3 = jax.random.split(key, 3)
    # layers[0]: xavier_uniform_ on torch weight (Cout, Cin, 1), zero bias.
    bound0 = (6.0 / (cin * 1 + cout * 1)) ** 0.5
    w1 = jax.random.uniform(k1, (cout, cin), jnp.float32, -bound0, bound0)
    b1 = jnp.zeros((cout, 1), jnp.float32)
    # layers[1]: PyTorch Conv1d default (kaiming-uniform style) init.
    bound1 = 1.0 / (cout ** 0.5)
    w2 = jax.random.uniform(k2, (cout, cout), jnp.float32, -bound1, bound1)
    b2 = jax.random.uniform(k3, (cout, 1), jnp.float32, -bound1, bound1)
    return dict(w1=w1, b1=b1, w2=w2, b2=b2)


if __name__ == "__main__":
    num_classes = 5
    avgpool_kernel = 256          # module default is 3840; kept small for demo
    n, n_seg = 2, 16
    cin = num_classes + 1
    l = n_seg * avgpool_kernel    # 4096

    key = jax.random.PRNGKey(0)
    kz, kp = jax.random.split(key)
    z = jax.random.normal(kz, (n, cin, l), jnp.float32)
    params = init_params(kp, num_classes)

    out = segment_classifier_forward(z, params, avgpool_kernel)
    out = jax.block_until_ready(out)
    assert out.shape == (n, num_classes, n_seg), out.shape

    # Pure-JAX reference following the PyTorch module exactly (no fusion):
    # AvgPool1d(K) -> Conv1d(1x1) -> Conv1d(1x1).
    pooled = z.reshape(n, cin, n_seg, avgpool_kernel).mean(axis=-1)
    h_ref = jnp.einsum("oc,ncs->nos", params["w1"], pooled) + params["b1"][None]
    ref = jnp.einsum("oc,ncs->nos", params["w2"], h_ref) + params["b2"][None]
    assert bool(jnp.all(jnp.isfinite(out)))
    assert jnp.allclose(out, ref, rtol=1e-4, atol=1e-4), \
        float(jnp.max(jnp.abs(out - ref)))
    print("KERNEL_OK")
</pallas_src>

<mosaic_0001>
module attributes {stable_mosaic.version = 11 : i64} {
  func.func @_segment_classifier_kernel(%arg0: i32, %arg1: i32, %arg2: memref<1x6x16x256xf32, #tpu.memory_space<vmem>>, %arg3: memref<5x6xf32, #tpu.memory_space<smem>>, %arg4: memref<5xf32, #tpu.memory_space<smem>>, %arg5: memref<1x5x16xf32, #tpu.memory_space<vmem>>) attributes {dimension_semantics = [#tpu.dimension_semantics<parallel>, #tpu.dimension_semantics<parallel>], iteration_bounds = array<i64: 2, 1>, scalar_prefetch = 0 : i64, scratch_operands = 0 : i64, tpu.core_type = #tpu.core_type<tc>, window_params = [{transform_indices = @transform_0, window_bounds = array<i64: 1, 6, 16, 256>}, {transform_indices = @transform_1, window_bounds = array<i64: 5, 6>}, {transform_indices = @transform_2, window_bounds = array<i64: 5>}, {transform_indices = @transform_3, window_bounds = array<i64: 1, 5, 16>}]} {
    %c0 = arith.constant 0 : index
    %c0_0 = arith.constant 0 : index
    %c0_1 = arith.constant 0 : index
    %c0_2 = arith.constant 0 : index
    %0 = vector.load %arg2[%c0, %c0_0, %c0_1, %c0_2] : memref<1x6x16x256xf32, #tpu.memory_space<vmem>>, vector<1x6x16x256xf32>
    %1 = vector.shape_cast %0 : vector<1x6x16x256xf32> to vector<6x16x256xf32>
    %cst = arith.constant dense<0.000000e+00> : vector<6x16xf32>
    %2 = vector.multi_reduction <add>, %1, %cst [2] : vector<6x16x256xf32> to vector<6x16xf32>
    %3 = vector.extract_strided_slice %2 {offsets = [0, 0], sizes = [1, 16], strides = [1, 1]} : vector<6x16xf32> to vector<1x16xf32>
    %c0_3 = arith.constant 0 : index
    %c0_4 = arith.constant 0 : index
    %4 = memref.load %arg3[%c0_3, %c0_4] : memref<5x6xf32, #tpu.memory_space<smem>>
    %5 = vector.broadcast %4 : f32 to vector<1x16xf32>
    %6 = arith.mulf %3, %5 : vector<1x16xf32>
    %7 = vector.extract_strided_slice %2 {offsets = [1, 0], sizes = [1, 16], strides = [1, 1]} : vector<6x16xf32> to vector<1x16xf32>
    %c0_5 = arith.constant 0 : index
    %c1 = arith.constant 1 : index
    %8 = memref.load %arg3[%c0_5, %c1] : memref<5x6xf32, #tpu.memory_space<smem>>
    %9 = vector.broadcast %8 : f32 to vector<1x16xf32>
    %10 = arith.mulf %7, %9 : vector<1x16xf32>
    %11 = arith.addf %6, %10 : vector<1x16xf32>
    %12 = vector.extract_strided_slice %2 {offsets = [2, 0], sizes = [1, 16], strides = [1, 1]} : vector<6x16xf32> to vector<1x16xf32>
    %c0_6 = arith.constant 0 : index
    %c2 = arith.constant 2 : index
    %13 = memref.load %arg3[%c0_6, %c2] : memref<5x6xf32, #tpu.memory_space<smem>>
    %14 = vector.broadcast %13 : f32 to vector<1x16xf32>
    %15 = arith.mulf %12, %14 : vector<1x16xf32>
    %16 = arith.addf %11, %15 : vector<1x16xf32>
    %17 = vector.extract_strided_slice %2 {offsets = [3, 0], sizes = [1, 16], strides = [1, 1]} : vector<6x16xf32> to vector<1x16xf32>
    %c0_7 = arith.constant 0 : index
    %c3 = arith.constant 3 : index
    %18 = memref.load %arg3[%c0_7, %c3] : memref<5x6xf32, #tpu.memory_space<smem>>
    %19 = vector.broadcast %18 : f32 to vector<1x16xf32>
    %20 = arith.mulf %17, %19 : vector<1x16xf32>
    %21 = arith.addf %16, %20 : vector<1x16xf32>
    %22 = vector.extract_strided_slice %2 {offsets = [4, 0], sizes = [1, 16], strides = [1, 1]} : vector<6x16xf32> to vector<1x16xf32>
    %c0_8 = arith.constant 0 : index
    %c4 = arith.constant 4 : index
    %23 = memref.load %arg3[%c0_8, %c4] : memref<5x6xf32, #tpu.memory_space<smem>>
    %24 = vector.broadcast %23 : f32 to vector<1x16xf32>
    %25 = arith.mulf %22, %24 : vector<1x16xf32>
    %26 = arith.addf %21, %25 : vector<1x16xf32>
    %27 = vector.extract_strided_slice %2 {offsets = [5, 0], sizes = [1, 16], strides = [1, 1]} : vector<6x16xf32> to vector<1x16xf32>
    %c0_9 = arith.constant 0 : index
    %c5 = arith.constant 5 : index
    %28 = memref.load %arg3[%c0_9, %c5] : memref<5x6xf32, #tpu.memory_space<smem>>
    %29 = vector.broadcast %28 : f32 to vector<1x16xf32>
    %30 = arith.mulf %27, %29 : vector<1x16xf32>
    %31 = arith.addf %26, %30 : vector<1x16xf32>
    %c0_10 = arith.constant 0 : index
    %32 = memref.load %arg4[%c0_10] : memref<5xf32, #tpu.memory_space<smem>>
    %33 = vector.broadcast %32 : f32 to vector<1x16xf32>
    %34 = arith.addf %31, %33 : vector<1x16xf32>
    %35 = vector.extract_strided_slice %2 {offsets = [0, 0], sizes = [1, 16], strides = [1, 1]} : vector<6x16xf32> to vector<1x16xf32>
    %c1_11 = arith.constant 1 : index
    %c0_12 = arith.constant 0 : index
    %36 = memref.load %arg3[%c1_11, %c0_12] : memref<5x6xf32, #tpu.memory_space<smem>>
    %37 = vector.broadcast %36 : f32 to vector<1x16xf32>
    %38 = arith.mulf %35, %37 : vector<1x16xf32>
    %39 = vector.extract_strided_slice %2 {offsets = [1, 0], sizes = [1, 16], strides = [1, 1]} : vector<6x16xf32> to vector<1x16xf32>
    %c1_13 = arith.constant 1 : index
    %c1_14 = arith.constant 1 : index
    %40 = memref.load %arg3[%c1_13, %c1_14] : memref<5x6xf32, #tpu.memory_space<smem>>
    %41 = vector.broadcast %40 : f32 to vector<1x16xf32>
    %42 = arith.mulf %39, %41 : vector<1x16xf32>
    %43 = arith.addf %38, %42 : vector<1x16xf32>
    %44 = vector.extract_strided_slice %2 {offsets = [2, 0], sizes = [1, 16], strides = [1, 1]} : vector<6x16xf32> to vector<1x16xf32>
    %c1_15 = arith.constant 1 : index
    %c2_16 = arith.constant 2 : index
    %45 = memref.load %arg3[%c1_15, %c2_16] : memref<5x6xf32, #tpu.memory_space<smem>>
    %46 = vector.broadcast %45 : f32 to vector<1x16xf32>
    %47 = arith.mulf %44, %46 : vector<1x16xf32>
    %48 = arith.addf %43, %47 : vector<1x16xf32>
    %49 = vector.extract_strided_slice %2 {offsets = [3, 0], sizes = [1, 16], strides = [1, 1]} : vector<6x16xf32> to vector<1x16xf32>
    %c1_17 = arith.constant 1 : index
    %c3_18 = arith.constant 3 : index
    %50 = memref.load %arg3[%c1_17, %c3_18] : memref<5x6xf32, #tpu.memory_space<smem>>
    %51 = vector.broadcast %50 : f32 to vector<1x16xf32>
    %52 = arith.mulf %49, %51 : vector<1x16xf32>
    %53 = arith.addf %48, %52 : vector<1x16xf32>
    %54 = vector.extract_strided_slice %2 {offsets = [4, 0], sizes = [1, 16], strides = [1, 1]} : vector<6x16xf32> to vector<1x16xf32>
    %c1_19 = arith.constant 1 : index
    %c4_20 = arith.constant 4 : index
    %55 = memref.load %arg3[%c1_19, %c4_20] : memref<5x6xf32, #tpu.memory_space<smem>>
    %56 = vector.broadcast %55 : f32 to vector<1x16xf32>
    %57 = arith.mulf %54, %56 : vector<1x16xf32>
    %58 = arith.addf %53, %57 : vector<1x16xf32>
    %59 = vector.extract_strided_slice %2 {offsets = [5, 0], sizes = [1, 16], strides = [1, 1]} : vector<6x16xf32> to vector<1x16xf32>
    %c1_21 = arith.constant 1 : index
    %c5_22 = arith.constant 5 : index
    %60 = memref.load %arg3[%c1_21, %c5_22] : memref<5x6xf32, #tpu.memory_space<smem>>
    %61 = vector.broadcast %60 : f32 to vector<1x16xf32>
    %62 = arith.mulf %59, %61 : vector<1x16xf32>
    %63 = arith.addf %58, %62 : vector<1x16xf32>
    %c1_23 = arith.constant 1 : index
    %64 = memref.load %arg4[%c1_23] : memref<5xf32, #tpu.memory_space<smem>>
    %65 = vector.broadcast %64 : f32 to vector<1x16xf32>
    %66 = arith.addf %63, %65 : vector<1x16xf32>
    %67 = vector.extract_strided_slice %2 {offsets = [0, 0], sizes = [1, 16], strides = [1, 1]} : vector<6x16xf32> to vector<1x16xf32>
    %c2_24 = arith.constant 2 : index
    %c0_25 = arith.constant 0 : index
    %68 = memref.load %arg3[%c2_24, %c0_25] : memref<5x6xf32, #tpu.memory_space<smem>>
    %69 = vector.broadcast %68 : f32 to vector<1x16xf32>
    %70 = arith.mulf %67, %69 : vector<1x16xf32>
    %71 = vector.extract_strided_slice %2 {offsets = [1, 0], sizes = [1, 16], strides = [1, 1]} : vector<6x16xf32> to vector<1x16xf32>
    %c2_26 = arith.constant 2 : index
    %c1_27 = arith.constant 1 : index
    %72 = memref.load %arg3[%c2_26, %c1_27] : memref<5x6xf32, #tpu.memory_space<smem>>
    %73 = vector.broadcast %72 : f32 to vector<1x16xf32>
    %74 = arith.mulf %71, %73 : vector<1x16xf32>
    %75 = arith.addf %70, %74 : vector<1x16xf32>
    %76 = vector.extract_strided_slice %2 {offsets = [2, 0], sizes = [1, 16], strides = [1, 1]} : vector<6x16xf32> to vector<1x16xf32>
    %c2_28 = arith.constant 2 : index
    %c2_29 = arith.constant 2 : index
    %77 = memref.load %arg3[%c2_28, %c2_29] : memref<5x6xf32, #tpu.memory_space<smem>>
    %78 = vector.broadcast %77 : f32 to vector<1x16xf32>
    %79 = arith.mulf %76, %78 : vector<1x16xf32>
    %80 = arith.addf %75, %79 : vector<1x16xf32>
    %81 = vector.extract_strided_slice %2 {offsets = [3, 0], sizes = [1, 16], strides = [1, 1]} : vector<6x16xf32> to vector<1x16xf32>
    %c2_30 = arith.constant 2 : index
    %c3_31 = arith.constant 3 : index
    %82 = memref.load %arg3[%c2_30, %c3_31] : memref<5x6xf32, #tpu.memory_space<smem>>
    %83 = vector.broadcast %82 : f32 to vector<1x16xf32>
    %84 = arith.mulf %81, %83 : vector<1x16xf32>
    %85 = arith.addf %80, %84 : vector<1x16xf32>
    %86 = vector.extract_strided_slice %2 {offsets = [4, 0], sizes = [1, 16], strides = [1, 1]} : vector<6x16xf32> to vector<1x16xf32>
    %c2_32 = arith.constant 2 : index
    %c4_33 = arith.constant 4 : index
    %87 = memref.load %arg3[%c2_32, %c4_33] : memref<5x6xf32, #tpu.memory_space<smem>>
    %88 = vector.broadcast %87 : f32 to vector<1x16xf32>
    %89 = arith.mulf %86, %88 : vector<1x16xf32>
    %90 = arith.addf %85, %89 : vector<1x16xf32>
    %91 = vector.extract_strided_slice %2 {offsets = [5, 0], sizes = [1, 16], strides = [1, 1]} : vector<6x16xf32> to vector<1x16xf32>
    %c2_34 = arith.constant 2 : index
    %c5_35 = arith.constant 5 : index
    %92 = memref.load %arg3[%c2_34, %c5_35] : memref<5x6xf32, #tpu.memory_space<smem>>
    %93 = vector.broadcast %92 : f32 to vector<1x16xf32>
    %94 = arith.mulf %91, %93 : vector<1x16xf32>
    %95 = arith.addf %90, %94 : vector<1x16xf32>
    %c2_36 = arith.constant 2 : index
    %96 = memref.load %arg4[%c2_36] : memref<5xf32, #tpu.memory_space<smem>>
    %97 = vector.broadcast %96 : f32 to vector<1x16xf32>
    %98 = arith.addf %95, %97 : vector<1x16xf32>
    %99 = vector.extract_strided_slice %2 {offsets = [0, 0], sizes = [1, 16], strides = [1, 1]} : vector<6x16xf32> to vector<1x16xf32>
    %c3_37 = arith.constant 3 : index
    %c0_38 = arith.constant 0 : index
    %100 = memref.load %arg3[%c3_37, %c0_38] : memref<5x6xf32, #tpu.memory_space<smem>>
    %101 = vector.broadcast %100 : f32 to vector<1x16xf32>
    %102 = arith.mulf %99, %101 : vector<1x16xf32>
    %103 = vector.extract_strided_slice %2 {offsets = [1, 0], sizes = [1, 16], strides = [1, 1]} : vector<6x16xf32> to vector<1x16xf32>
    %c3_39 = arith.constant 3 : index
    %c1_40 = arith.constant 1 : index
    %104 = memref.load %arg3[%c3_39, %c1_40] : memref<5x6xf32, #tpu.memory_space<smem>>
    %105 = vector.broadcast %104 : f32 to vector<1x16xf32>
    %106 = arith.mulf %103, %105 : vector<1x16xf32>
    %107 = arith.addf %102, %106 : vector<1x16xf32>
    %108 = vector.extract_strided_slice %2 {offsets = [2, 0], sizes = [1, 16], strides = [1, 1]} : vector<6x16xf32> to vector<1x16xf32>
    %c3_41 = arith.constant 3 : index
    %c2_42 = arith.constant 2 : index
    %109 = memref.load %arg3[%c3_41, %c2_42] : memref<5x6xf32, #tpu.memory_space<smem>>
    %110 = vector.broadcast %109 : f32 to vector<1x16xf32>
    %111 = arith.mulf %108, %110 : vector<1x16xf32>
    %112 = arith.addf %107, %111 : vector<1x16xf32>
    %113 = vector.extract_strided_slice %2 {offsets = [3, 0], sizes = [1, 16], strides = [1, 1]} : vector<6x16xf32> to vector<1x16xf32>
    %c3_43 = arith.constant 3 : index
    %c3_44 = arith.constant 3 : index
    %114 = memref.load %arg3[%c3_43, %c3_44] : memref<5x6xf32, #tpu.memory_space<smem>>
    %115 = vector.broadcast %114 : f32 to vector<1x16xf32>
    %116 = arith.mulf %113, %115 : vector<1x16xf32>
    %117 = arith.addf %112, %116 : vector<1x16xf32>
    %118 = vector.extract_strided_slice %2 {offsets = [4, 0], sizes = [1, 16], strides = [1, 1]} : vector<6x16xf32> to vector<1x16xf32>
    %c3_45 = arith.constant 3 : index
    %c4_46 = arith.constant 4 : index
    %119 = memref.load %arg3[%c3_45, %c4_46] : memref<5x6xf32, #tpu.memory_space<smem>>
    %120 = vector.broadcast %119 : f32 to vector<1x16xf32>
    %121 = arith.mulf %118, %120 : vector<1x16xf32>
    %122 = arith.addf %117, %121 : vector<1x16xf32>
    %123 = vector.extract_strided_slice %2 {offsets = [5, 0], sizes = [1, 16], strides = [1, 1]} : vector<6x16xf32> to vector<1x16xf32>
    %c3_47 = arith.constant 3 : index
    %c5_48 = arith.constant 5 : index
    %124 = memref.load %arg3[%c3_47, %c5_48] : memref<5x6xf32, #tpu.memory_space<smem>>
    %125 = vector.broadcast %124 : f32 to vector<1x16xf32>
    %126 = arith.mulf %123, %125 : vector<1x16xf32>
    %127 = arith.addf %122, %126 : vector<1x16xf32>
    %c3_49 = arith.constant 3 : index
    %128 = memref.load %arg4[%c3_49] : memref<5xf32, #tpu.memory_space<smem>>
    %129 = vector.broadcast %128 : f32 to vector<1x16xf32>
    %130 = arith.addf %127, %129 : vector<1x16xf32>
    %131 = vector.extract_strided_slice %2 {offsets = [0, 0], sizes = [1, 16], strides = [1, 1]} : vector<6x16xf32> to vector<1x16xf32>
    %c4_50 = arith.constant 4 : index
    %c0_51 = arith.constant 0 : index
    %132 = memref.load %arg3[%c4_50, %c0_51] : memref<5x6xf32, #tpu.memory_space<smem>>
    %133 = vector.broadcast %132 : f32 to vector<1x16xf32>
    %134 = arith.mulf %131, %133 : vector<1x16xf32>
    %135 = vector.extract_strided_slice %2 {offsets = [1, 0], sizes = [1, 16], strides = [1, 1]} : vector<6x16xf32> to vector<1x16xf32>
    %c4_52 = arith.constant 4 : index
    %c1_53 = arith.constant 1 : index
    %136 = memref.load %arg3[%c4_52, %c1_53] : memref<5x6xf32, #tpu.memory_space<smem>>
    %137 = vector.broadcast %136 : f32 to vector<1x16xf32>
    %138 = arith.mulf %135, %137 : vector<1x16xf32>
    %139 = arith.addf %134, %138 : vector<1x16xf32>
    %140 = vector.extract_strided_slice %2 {offsets = [2, 0], sizes = [1, 16], strides = [1, 1]} : vector<6x16xf32> to vector<1x16xf32>
    %c4_54 = arith.constant 4 : index
    %c2_55 = arith.constant 2 : index
    %141 = memref.load %arg3[%c4_54, %c2_55] : memref<5x6xf32, #tpu.memory_space<smem>>
    %142 = vector.broadcast %141 : f32 to vector<1x16xf32>
    %143 = arith.mulf %140, %142 : vector<1x16xf32>
    %144 = arith.addf %139, %143 : vector<1x16xf32>
    %145 = vector.extract_strided_slice %2 {offsets = [3, 0], sizes = [1, 16], strides = [1, 1]} : vector<6x16xf32> to vector<1x16xf32>
    %c4_56 = arith.constant 4 : index
    %c3_57 = arith.constant 3 : index
    %146 = memref.load %arg3[%c4_56, %c3_57] : memref<5x6xf32, #tpu.memory_space<smem>>
    %147 = vector.broadcast %146 : f32 to vector<1x16xf32>
    %148 = arith.mulf %145, %147 : vector<1x16xf32>
    %149 = arith.addf %144, %148 : vector<1x16xf32>
    %150 = vector.extract_strided_slice %2 {offsets = [4, 0], sizes = [1, 16], strides = [1, 1]} : vector<6x16xf32> to vector<1x16xf32>
    %c4_58 = arith.constant 4 : index
    %c4_59 = arith.constant 4 : index
    %151 = memref.load %arg3[%c4_58, %c4_59] : memref<5x6xf32, #tpu.memory_space<smem>>
    %152 = vector.broadcast %151 : f32 to vector<1x16xf32>
    %153 = arith.mulf %150, %152 : vector<1x16xf32>
    %154 = arith.addf %149, %153 : vector<1x16xf32>
    %155 = vector.extract_strided_slice %2 {offsets = [5, 0], sizes = [1, 16], strides = [1, 1]} : vector<6x16xf32> to vector<1x16xf32>
    %c4_60 = arith.constant 4 : index
    %c5_61 = arith.constant 5 : index
    %156 = memref.load %arg3[%c4_60, %c5_61] : memref<5x6xf32, #tpu.memory_space<smem>>
    %157 = vector.broadcast %156 : f32 to vector<1x16xf32>
    %158 = arith.mulf %155, %157 : vector<1x16xf32>
    %159 = arith.addf %154, %158 : vector<1x16xf32>
    %c4_62 = arith.constant 4 : index
    %160 = memref.load %arg4[%c4_62] : memref<5xf32, #tpu.memory_space<smem>>
    %161 = vector.broadcast %160 : f32 to vector<1x16xf32>
    %162 = arith.addf %159, %161 : vector<1x16xf32>
    %163 = tpu.concatenate %34, %66, %98, %130, %162 in 0 : vector<1x16xf32>, vector<1x16xf32>, vector<1x16xf32>, vector<1x16xf32>, vector<1x16xf32> -> vector<5x16xf32>
    %c0_63 = arith.constant 0 : index
    %c0_64 = arith.constant 0 : index
    %c0_65 = arith.constant 0 : index
    %164 = vector.load %arg5[%c0_63, %c0_64, %c0_65] : memref<1x5x16xf32, #tpu.memory_space<vmem>>, vector<1x5x16xf32>
    %165 = vector.shape_cast %164 : vector<1x5x16xf32> to vector<5x16xf32>
    %166 = vector.shape_cast %163 : vector<5x16xf32> to vector<1x5x16xf32>
    tpu.vector_store %arg5[%c0_63, %c0_64, %c0_65], %166 {strides = array<i32>} : memref<1x5x16xf32, #tpu.memory_space<vmem>>, vector<1x5x16xf32>,
    return
  }
  func.func @transform_0(%arg0: i32, %arg1: i32) -> (i32, i32, i32, i32) {
    %c0_i32 = arith.constant 0 : i32
    %c0_i32_0 = arith.constant 0 : i32
    %c0_i32_1 = arith.constant 0 : i32
    return %arg0, %c0_i32, %arg1, %c0_i32_0 : i32, i32, i32, i32
  }
  func.func @transform_1(%arg0: i32, %arg1: i32) -> (i32, i32) {
    %c0_i32 = arith.constant 0 : i32
    %c0_i32_0 = arith.constant 0 : i32
    %c0_i32_1 = arith.constant 0 : i32
    return %c0_i32, %c0_i32_0 : i32, i32
  }
  func.func @transform_2(%arg0: i32, %arg1: i32) -> i32 {
    %c0_i32 = arith.constant 0 : i32
    %c0_i32_0 = arith.constant 0 : i32
    return %c0_i32 : i32
  }
  func.func @transform_3(%arg0: i32, %arg1: i32) -> (i32, i32, i32) {
    %c0_i32 = arith.constant 0 : i32
    %c0_i32_0 = arith.constant 0 : i32
    return %arg0, %c0_i32, %arg1 : i32, i32, i32
  }
}

</mosaic_0001>

<bundles_post_ra>
// kernel: tpu_custom_call.1
= control target key start
LH: loop header
LB: loop body
LE: loop exit
PB: predicated region body
PF: predicated region fallthrough
CT: control target
= control target key end

     0   :  { %s1302_s0 = inlined_call_operand.hbm [shape: f32[2,6,16,256], index: 0, kind: input, shape index: {}]   ;;  %s1303_s1 = inlined_call_operand.hbm [shape: f32[5,6], index: 1, kind: input, shape index: {}]   ;;  %s1304_s2 = inlined_call_operand.vmem [shape: f32[5], index: 2, kind: input, shape index: {}]   ;;  %s1305_s3 = inlined_call_operand.vmem [shape: f32[2,5,16], index: 3, kind: output, shape index: {}]  }
   0x1   :  { %1315 = sst [smem:[#allocation21_spill]] %s1302_s0 }
   0x2   :  { %1316 = sst [smem:[#allocation22_spill]] %s1303_s1 }
   0x3   :  { %1317 = sst [smem:[#allocation23_spill]] %s1304_s2 }
   0x4   :  { %1318 = sst [smem:[#allocation24_spill]] %s1305_s3 }
   0x5   :  { %8 = vsyncpa [#allocation3], 0 }
   0x6   :  { %10 = vsyncpa [#allocation3 + $0x1], 0 }
   0x7   :  { %11 = vsyncpa [#allocation4], 0 }
   0x8   :  { %12 = vsyncpa [#allocation5], 0  ;;  %s919_s12 = smov 0   ;;  %s921_s13 = smov 0  }
   0x9   :  { %s923_s14 = smov 0   ;;  %s925_s15 = smov 0  }
   0xa   :  { %s927_s16 = smov 0   ;;  %s929_s17 = smov 0  }
   0xb LB: > { %1319 = sst [smem:[#allocation11_spill]] %s877_s13  ;;  %s648_s18 = sadd.s32 4294967295, %s893_s17   ;;  %s893_s17 = sphi %s929_s17, %s18_s17   ;;  %s889_s16 = sphi %s927_s16, %s1346_s16   ;;  %s885_s15 = sphi %s925_s15, %s1345_s15   ;;  %s881_s14 = sphi %s923_s14, %s1344_s14   ;;  %s877_s13 = sphi %s921_s13, %s1343_s13   ;;  %s873_s12 = sphi %s919_s12, %s1342_s12  }
   0xc   : > { %1320 = sst [smem:[#allocation12_spill]] %s881_s14  ;;  %s39_s19 = sadd.s32 1, %s881_s14 }
   0xd   : > { %1321 = sst [smem:[#allocation13_spill]] %s885_s15  ;;  %p46_p0 = scmp.ne.s32.totalorder %s881_s14, %s877_s13 }
   0xe   : > { %1322 = sst [smem:[#allocation14_spill]] %s889_s16  ;;  %p47_p1 = scmp.eq.s32.totalorder %s893_s17, 0 }
   0xf   : > { %1323 = sst [smem:[#allocation15_spill]] %s893_s17  ;;  %p52_p2 = scmp.ne.s32.totalorder %s877_s13, %s873_s12 }
  0x10   : > { %p953_p3 = scmp.eq.s32.totalorder %s648_s18, 0  ;;  %p48_p4 = por %p47_p1, %p46_p0 }
  0x11   : > { %p650_p5 = scmp.ge.s32.totalorder %s893_s17, 1  ;;  %p133_p7 = scmp.lt.s32.totalorder %s893_s17, 3 }
  0x12   : > { %p960_p6 = por %p953_p3, %p52_p2  ;;  %s1326_s1 = sld [smem:[#allocation22_spill]] }
  0x13   : > { %p968_p8 = pnand %p650_p5, %p133_p7  ;;  %p720_p10 = scmp.lt.s32.totalorder %s893_s17, 2 }
  0x14   : > { %s1328_s2 = sld [smem:[#allocation23_spill]]  ;;  %s895_s30 = smov [#allocation6]  }
  0x15   : > { %p707_p9 = pneg %p968_p8  ;;  %p980_p12 = pnand %p720_p10, %p48_p4 }
  0x16   : > { %s896_s4 = smov [#allocation7]   ;;  %s166_s5 = sand.u32 1, %s881_s14  }
  0x17   : > { %p708_p11 = pnand %p707_p9, %p953_p3  ;;  %s30_s6 = sadd.s32 1, %s889_s16 }
  0x18   : > { %s145_s24 = sshll.u32 %s1326_s1, 4  ;;  %p32_p13 = scmp.ge.s32.totalorder %s30_s6, 2  ;;  %s146_s24 = int_to_ptr.hbm [resolvable:$true] %s145_s24 }
  0x19   : > { %710 = dma.hbm_to_smem (!%p708_p11), %s146_s24, 128, %s895_s30, [#allocation4]  }
  0x1a   : > { %s155_s28 = sshll.u32 %s1328_s2, 4  ;;  %s694_s7 = smul.u32 192, %s166_s5  ;;  %s156_s28 = int_to_ptr.vmem [resolvable:$true] %s155_s28 }
  0x1b   : > { %713 = dma.vmem_to_smem (!%p708_p11), %s156_s28, 16, %s896_s4, [#allocation5]  }
  0x1c   : > { %s695_s8 = smul.u32 192, %s889_s16  ;;  %s1348_s6 = smov (%p32_p13, %s30_s6), 0 }
  0x1d   : > { %1330 = sst [smem:[#allocation16_spill]] %s1348_s6  ;;  %s34_s12 = ssub.s32 %s889_s16, %s1348_s6 }
  0x1e   : > { %s1331_s0 = sld [smem:[#allocation21_spill]]  ;;  %p37_p0 = scmp.eq.s32.totalorder %s34_s12, 0 }
  0x1f   : > { %s170_s22 = scalar_lea.vmem [#allocation2], %s694_s7  ;;  %s167_s26 = scalar_lea.sflag [#allocation3], %s166_s5 }
  0x20   : > { %s181_s23 = sshll.u32 %s170_s22, 4  ;;  %s897_s27 = smov 256   ;;  %s182_s23 = int_to_ptr.vmem [resolvable:$true] %s181_s23 }
  0x21   : > { %s997_s24 = scalar_select %p37_p0, %s881_s14, %s39_s19  }
  0x22   : > { %s898_s28 = smov 16   ;;  %193 = sbr.rel (%p968_p8) target bundleno = 212 (0xd4), region = 32 }
  0x23   : > { %1332 = sst [smem:[#allocation17_spill]] %s997_s24 }
  0x24   : > { %s178_s11 = scalar_lea.hbm %s1331_s0, %s695_s8 }
  0x25   : > { %s179_s18 = sshll.u32 %s178_s11, 4  ;;  %s180_s18 = int_to_ptr.hbm [resolvable:$true] %s179_s18 }
  0x26   : > { %717 = dma.hbm_to_vmem [thread:$0]  (!%p980_p12), %s180_s18, 3072, %s182_s23, %s167_s26, %s897_s27, %s897_s27, %s898_s28  }
  0x27   : > { %s195_s30 = sand.u32 1, %s877_s13  }
  0x28   : > { %s696_s4 = smul.u32 192, %s195_s30  ;;  %s196_s8 = scalar_lea.sflag [#allocation3], %s195_s30 }
  0x2a   : > { %s1004_s9 = scalar_lea.vmem [#allocation2], %s696_s4 }
  0x2b   : > { %860 = dma.done.wait (%p960_p6), %s196_s8, 3072  }
  0x2c   : > { %862 = vsyncadd (%p960_p6), %s196_s8, 4294964224 }
  0x2d   : > { %864 = dma.done.wait (%p953_p3), [#allocation4], 128  }
  0x2e   : > { %866 = vsyncadd (%p953_p3), [#allocation4], 4294967168 }
  0x2f   : > { %868 = dma.done.wait (%p953_p3), [#allocation5], 16  }
  0x30   : > { %870 = vsyncadd (%p953_p3), [#allocation5], 4294967280 }
  0x31   : > { %215 = sfence }
  0x32   : > { %v248_v0 = vld [vmem:[%s1004_s9 + $0x20] sm:$0xff]  ;;  %v249_v1 = vld [vmem:[%s1004_s9 + $0x28] sm:$0xff]  ;;  %v250_v9 = vld [vmem:[%s1004_s9 + $0x30] sm:$0xff]  ;;  %s1042_s19 = sld [smem:[#allocation6 + $0x1]]  ;;  %vm501_vm0 = vcmask 130112   ;;  %vm528_vm1 = vcmask 1040384  }
  0x33   : > { %v244_v2 = vld [vmem:[%s1004_s9] sm:$0xff]  ;;  %v274_v3 = vadd.f32 %v249_v1, %v248_v0  ;;  %v245_v4 = vld [vmem:[%s1004_s9 + $0x8] sm:$0xff]  ;;  %v251_v10 = vld [vmem:[%s1004_s9 + $0x38] sm:$0xff]  ;;  %s1044_s20 = sld [smem:[#allocation6 + $0x81]]  ;;  %v496_v1 = vlaneseq  ;;  %vm530_vm2 = vcmask 1041408   ;;  %vm532_vm3 = vcmask 1042432  }
  0x34   : > { %v252_v5 = vld [vmem:[%s1004_s9 + $0x40] sm:$0xff]  ;;  %v253_v6 = vld [vmem:[%s1004_s9 + $0x48] sm:$0xff]  ;;  %v268_v7 = vadd.f32 %v245_v4, %v244_v2  ;;  %v246_v11 = vld [vmem:[%s1004_s9 + $0x10] sm:$0xff]  ;;  %v277_v15 = vadd.f32 %v251_v10, %v250_v9  ;;  %s1046_s21 = sld [smem:[#allocation6 + $0x101]]  ;;  %vm534_vm4 = vcmask 1043456   ;;  %vm536_vm5 = vcmask 126976  }
  0x35   : > { %v280_v8 = vadd.f32 %v253_v6, %v252_v5  ;;  %275 = vadd.xlane.f32.xlu1 %v274_v3  ;;  %v247_v12 = vld [vmem:[%s1004_s9 + $0x18] sm:$0xff]  ;;  %v254_v13 = vld [vmem:[%s1004_s9 + $0x50] sm:$0xff]  ;;  %v256_v20 = vld [vmem:[%s1004_s9 + $0x60] sm:$0xff]  ;;  %s1048_s25 = sld [smem:[#allocation6 + $0x181]] }
  0x36   : > { %269 = vadd.xlane.f32.xlu0 %v268_v7  ;;  %v255_v14 = vld [vmem:[%s1004_s9 + $0x58] sm:$0xff]  ;;  %v271_v16 = vadd.f32 %v247_v12, %v246_v11  ;;  %v258_v18 = vld [vmem:[%s1004_s9 + $0x70] sm:$0xff]  ;;  %v257_v21 = vld [vmem:[%s1004_s9 + $0x68] sm:$0xff]  ;;  %s1050_s29 = sld [smem:[#allocation6 + $0x201]] }
  0x37   : > { %281 = vadd.xlane.f32.xlu2 %v280_v8  ;;  %v283_v17 = vadd.f32 %v255_v14, %v254_v13  ;;  %v259_v19 = vld [vmem:[%s1004_s9 + $0x78] sm:$0xff]  ;;  %v260_v22 = vld [vmem:[%s1004_s9 + $0x80] sm:$0xff]  ;;  %v261_v23 = vld [vmem:[%s1004_s9 + $0x88] sm:$0xff]  ;;  %v286_v25 = vadd.f32 %v257_v21, %v256_v20  ;;  %s1052_s5 = sld [smem:[#allocation6]] }
  0x38   : > { %v289_v24 = vadd.f32 %v259_v19, %v258_v18  ;;  %v292_v26 = vadd.f32 %v261_v23, %v260_v22  ;;  %v264_v27 = vld [vmem:[%s1004_s9 + $0xa0] sm:$0xff]  ;;  %v265_v28 = vld [vmem:[%s1004_s9 + $0xa8] sm:$0xff]  ;;  %v262_v29 = vld [vmem:[%s1004_s9 + $0x90] sm:$0xff]  ;;  %s1054_s7 = sld [smem:[#allocation6 + $0x80]]  ;;  %v309_v36 = vstv %s1042_s19  ;;  %v1151_v18 = vand.u32 127, %v496_v1 }
  0x39   : > { %v263_v30 = vld [vmem:[%s1004_s9 + $0x98] sm:$0xff]  ;;  %v266_v31 = vld [vmem:[%s1004_s9 + $0xb0] sm:$0xff]  ;;  %v298_v33 = vadd.f32 %v265_v28, %v264_v27  ;;  %s1056_s10 = sld [smem:[#allocation6 + $0x100]]  ;;  %v347_v37 = vstv %s1044_s20 }
  0x3a   : > { %v267_v32 = vld [vmem:[%s1004_s9 + $0xb8] sm:$0xff]  ;;  %v295_v34 = vadd.f32 %v263_v30, %v262_v29  ;;  %s1058_s11 = sld [smem:[#allocation6 + $0x180]]  ;;  %v385_v38 = vstv %s1046_s21 }
  0x3b   : > { %v301_v35 = vadd.f32 %v267_v32, %v266_v31  ;;  %s1060_s12 = sld [smem:[#allocation6 + $0x200]]  ;;  %v423_v39 = vstv %s1048_s25 }
  0x3c   : > { %s1062_s18 = sld [smem:[#allocation6 + $0x2]]  ;;  %v461_v40 = vstv %s1050_s29 }
  0x3d   : > { %278 = vadd.xlane.f32.xlu1 %v277_v15  ;;  %s1064_s22 = sld [smem:[#allocation6 + $0x82]]  ;;  %v305_v41 = vstv %s1052_s5 }
  0x3e   : > { %272 = vadd.xlane.f32.xlu0 %v271_v16  ;;  %s1066_s23 = sld [smem:[#allocation6 + $0x102]]  ;;  %v343_v42 = vstv %s1054_s7 }
  0x3f   : > { %284 = vadd.xlane.f32.xlu2 %v283_v17  ;;  %s1068_s26 = sld [smem:[#allocation6 + $0x182]]  ;;  %v381_v44 = vstv %s1056_s10 }
  0x40   : > { %s1070_s27 = sld [smem:[#allocation6 + $0x202]]  ;;  %v419_v45 = vstv %s1058_s11 }
  0x41   : > { %s1072_s28 = sld [smem:[#allocation6 + $0x3]]  ;;  %v457_v46 = vstv %s1060_s12 }
  0x42   : > { %s1074_s30 = sld [smem:[#allocation6 + $0x83]]  ;;  %v315_v47 = vstv %s1062_s18 }
  0x43   : > { %s1076_s4 = sld [smem:[#allocation6 + $0x103]]  ;;  %v353_v49 = vstv %s1064_s22 }
  0x44   : > { %s1078_s8 = sld [smem:[#allocation6 + $0x183]]  ;;  %v391_v50 = vstv %s1066_s23 }
  0x45   : > { %290 = vadd.xlane.f32.xlu1 %v289_v24  ;;  %s1080_s9 = sld [smem:[#allocation6 + $0x203]]  ;;  %v429_v51 = vstv %s1068_s26 }
  0x46   : > { %287 = vadd.xlane.f32.xlu0 %v286_v25  ;;  %s1082_s0 = sld [smem:[#allocation6 + $0x5]]  ;;  %v467_v52 = vstv %s1070_s27 }
  0x47   : > { %293 = vadd.xlane.f32.xlu2 %v292_v26  ;;  %s1084_s1 = sld [smem:[#allocation6 + $0x85]]  ;;  %v321_v54 = vstv %s1072_s28 }
  0x48   : > { %s1086_s2 = sld [smem:[#allocation6 + $0x105]]  ;;  %v359_v55 = vstv %s1074_s30 }
  0x49   : > { %s1088_s6 = sld [smem:[#allocation6 + $0x185]]  ;;  %v397_v56 = vstv %s1076_s4 }
  0x4a   : > { %s1090_s16 = sld [smem:[#allocation6 + $0x205]]  ;;  %v435_v57 = vstv %s1078_s8 }
  0x4b   : > { %s1092_s24 = sld [smem:[#allocation6 + $0x4]]  ;;  %v473_v58 = vstv %s1080_s9 }
  0x4c   : > { %s1094_s14 = sld [smem:[#allocation7]]  ;;  %v333_v62 = vstv %s1082_s0 }
  0x4d   : > { %299 = vadd.xlane.f32.xlu1 %v298_v33  ;;  %s1096_s13 = sld [smem:[#allocation6 + $0x84]]  ;;  %v371_v63 = vstv %s1084_s1 }
  0x4e   : > { %296 = vadd.xlane.f32.xlu0 %v295_v34  ;;  %s1098_s17 = sld [smem:[#allocation7 + $0x1]]  ;;  %v409_v0 = vstv %s1086_s2 }
  0x4f   : > { %302 = vadd.xlane.f32.xlu2 %v301_v35  ;;  %1333 = sst [smem:[#allocation18_spill]] %s1088_s6 }
  0x50   : > { %s1100_s3 = sld [smem:[#allocation6 + $0x104]]  ;;  %v485_v3 = vstv %s1090_s16 }
  0x51   : > { %s1102_s15 = sld [smem:[#allocation6 + $0x184]]  ;;  %v327_v59 = vstv %s1092_s24 }
  0x52   : > { %1334 = sst [smem:[#allocation19_spill]] %s1094_s14 }
  0x53   : > { %s1104_s6 = sld [smem:[#allocation6 + $0x204]]  ;;  %v365_v60 = vstv %s1096_s13 }
  0x54   : > { %1335 = sst [smem:[#allocation20_spill]] %s1098_s17 }
  0x55   : > { %s1109_s14 = sld [smem:[#allocation7 + $0x2]] }
  0x56   : > { %s1115_s17 = sld [smem:[#allocation7 + $0x3]]  ;;  %v403_v61 = vstv %s1100_s3 }
  0x57   : > { %s1121_s19 = sld [smem:[#allocation7 + $0x4]]  ;;  %v441_v4 = vstv %s1102_s15 }
  0x58   : > { %s1336_s5 = sld [smem:[#allocation18_spill]] }
  0x59   : > { %s1337_s7 = sld [smem:[#allocation19_spill]]  ;;  %v479_v5 = vstv %s1104_s6 }
  0x5a   : > { %s1338_s10 = sld [smem:[#allocation20_spill]] }
  0x5b   : > { %v415_v15 = vstv %s1109_s14  ;;  %s1339_s20 = sld [smem:[#allocation13_spill]] }
  0x5c   : > { %v453_v16 = vstv %s1115_s17  ;;  %s1340_s3 = sld [smem:[#allocation24_spill]] }
  0x5d   : > { %v491_v17 = vstv %s1121_s19 }
  0x5e   : > { %v447_v2 = vstv %s1336_s5 }
  0x5f   : > { %v339_v12 = vstv %s1337_s7 }
  0x60   : > { %v377_v13 = vstv %s1338_s10 }
  0x61   : > { %p237_p1 = scmp.lt.s32.totalorder %s1339_s20, 1 }
  0x63   : > { %s1350_s20 = smov (!%p237_p1, %s1339_s20), 1 }
  0x64   : > { %s658_s0 = sshll.u32 %s1350_s20, 3 }
  0x65   : > { %s243_s13 = scalar_lea.vmem %s1340_s3, %s658_s0 }
  0xa8   : > { %v276_v43 = vpop.xlane.xlu1 %275 }
  0xa9   : > { %v270_v48 = vpop.xlane.xlu0 %269  ;;  %v310_v6 = vmul.f32 %v309_v36, %v276_v43  ;;  %v348_v7 = vmul.f32 %v347_v37, %v276_v43  ;;  %v386_v10 = vmul.f32 %v385_v38, %v276_v43  ;;  %v424_v19 = vmul.f32 %v423_v39, %v276_v43 }
  0xaa   : > { %v282_v53 = vpop.xlane.xlu2 %281  ;;  %v306_v8 = vmul.f32 %v305_v41, %v270_v48  ;;  %v344_v9 = vmul.f32 %v343_v42, %v270_v48  ;;  %v382_v11 = vmul.f32 %v381_v44, %v270_v48  ;;  %v462_v20 = vmul.f32 %v461_v40, %v276_v43 }
  0xab   : > { %v420_v21 = vmul.f32 %v419_v45, %v270_v48  ;;  %v458_v22 = vmul.f32 %v457_v46, %v270_v48  ;;  %v316_v27 = vmul.f32 %v315_v47, %v282_v53  ;;  %v354_v28 = vmul.f32 %v353_v49, %v282_v53 }
  0xac   : > { %v312_v25 = vadd.f32 %v310_v6, %v306_v8  ;;  %v350_v26 = vadd.f32 %v348_v7, %v344_v9  ;;  %v388_v29 = vadd.f32 %v386_v10, %v382_v11  ;;  %v392_v30 = vmul.f32 %v391_v50, %v282_v53 }
  0xad   : > { %v426_v8 = vadd.f32 %v424_v19, %v420_v21 }
  0xae   : > { %v318_v9 = vadd.f32 %v316_v27, %v312_v25 }
  0xb0   : > { %v279_v14 = vpop.xlane.xlu1 %278 }
  0xb1   : > { %v273_v23 = vpop.xlane.xlu0 %272  ;;  %v311_v31 = vmul.f32 %v309_v36, %v279_v14  ;;  %v349_v33 = vmul.f32 %v347_v37, %v279_v14  ;;  %v387_v34 = vmul.f32 %v385_v38, %v279_v14  ;;  %v425_v48 = vmul.f32 %v423_v39, %v279_v14 }
  0xb2   : > { %v285_v24 = vpop.xlane.xlu2 %284  ;;  %v307_v32 = vmul.f32 %v305_v41, %v273_v23  ;;  %v345_v35 = vmul.f32 %v343_v42, %v273_v23  ;;  %v383_v43 = vmul.f32 %v381_v44, %v273_v23  ;;  %v463_v1 = vmul.f32 %v461_v40, %v279_v14 }
  0xb3   : > { %v421_v6 = vmul.f32 %v419_v45, %v273_v23  ;;  %v459_v7 = vmul.f32 %v457_v46, %v273_v23  ;;  %v464_v36 = vadd.f32 %v462_v20, %v458_v22  ;;  %v430_v41 = vmul.f32 %v429_v51, %v282_v53 }
  0xb4   : > { %v468_v37 = vmul.f32 %v467_v52, %v282_v53  ;;  %v356_v38 = vadd.f32 %v354_v28, %v350_v26  ;;  %v313_v42 = vadd.f32 %v311_v31, %v307_v32  ;;  %v317_v44 = vmul.f32 %v315_v47, %v285_v24 }
  0xb5   : > { %v351_v39 = vadd.f32 %v349_v33, %v345_v35  ;;  %v389_v40 = vadd.f32 %v387_v34, %v383_v43  ;;  %v355_v45 = vmul.f32 %v353_v49, %v285_v24  ;;  %v393_v46 = vmul.f32 %v391_v50, %v285_v24 }
  0xb6   : > { %v427_v11 = vadd.f32 %v425_v48, %v421_v6  ;;  %v465_v53 = vadd.f32 %v463_v1, %v459_v7  ;;  %v431_v14 = vmul.f32 %v429_v51, %v285_v24  ;;  %v469_v19 = vmul.f32 %v467_v52, %v285_v24 }
  0xb7   : > { %v394_v20 = vadd.f32 %v392_v30, %v388_v29  ;;  %v432_v21 = vadd.f32 %v430_v41, %v426_v8  ;;  %v470_v22 = vadd.f32 %v468_v37, %v464_v36  ;;  %v319_v50 = vadd.f32 %v317_v44, %v313_v42 }
  0xb8   : > { %v291_v10 = vpop.xlane.xlu1 %290  ;;  %v357_v52 = vadd.f32 %v355_v45, %v351_v39  ;;  %v395_v29 = vadd.f32 %v393_v46, %v389_v40  ;;  %v433_v30 = vadd.f32 %v431_v14, %v427_v11  ;;  %v471_v31 = vadd.f32 %v469_v19, %v465_v53 }
  0xb9   : > { %v288_v47 = vpop.xlane.xlu0 %287  ;;  %v323_v23 = vmul.f32 %v321_v54, %v291_v10  ;;  %v361_v24 = vmul.f32 %v359_v55, %v291_v10  ;;  %v437_v32 = vmul.f32 %v435_v57, %v291_v10  ;;  %v475_v33 = vmul.f32 %v473_v58, %v291_v10 }
  0xba   : > { %v322_v49 = vmul.f32 %v321_v54, %v288_v47  ;;  %v360_v25 = vmul.f32 %v359_v55, %v288_v47  ;;  %v398_v26 = vmul.f32 %v397_v56, %v288_v47  ;;  %v294_v51 = vpop.xlane.xlu2 %293  ;;  %v436_v27 = vmul.f32 %v435_v57, %v288_v47 }
  0xbb   : > { %v474_v28 = vmul.f32 %v473_v58, %v288_v47  ;;  %v399_v54 = vmul.f32 %v397_v56, %v291_v10  ;;  %v328_v55 = vmul.f32 %v327_v59, %v294_v51  ;;  %v325_v48 = vadd.f32 %v323_v23, %v319_v50 }
  0xbc   : > { %v324_v34 = vadd.f32 %v322_v49, %v318_v9  ;;  %v362_v35 = vadd.f32 %v360_v25, %v356_v38  ;;  %v400_v43 = vadd.f32 %v398_v26, %v394_v20  ;;  %v366_v1 = vmul.f32 %v365_v60, %v294_v51 }
  0xbd   : > { %v438_v6 = vadd.f32 %v436_v27, %v432_v21  ;;  %v476_v7 = vadd.f32 %v474_v28, %v470_v22  ;;  %v363_v57 = vadd.f32 %v361_v24, %v357_v52  ;;  %v404_v8 = vmul.f32 %v403_v61, %v294_v51 }
  0xbe   : > { %v442_v41 = vmul.f32 %v441_v4, %v294_v51  ;;  %v480_v37 = vmul.f32 %v479_v5, %v294_v51  ;;  %v330_v42 = vadd.f32 %v328_v55, %v324_v34  ;;  %v401_v44 = vadd.f32 %v399_v54, %v395_v29 }
  0xbf   : > { %v368_v45 = vadd.f32 %v366_v1, %v362_v35  ;;  %v439_v46 = vadd.f32 %v437_v32, %v433_v30  ;;  %v406_v53 = vadd.f32 %v404_v8, %v400_v43  ;;  %v477_v14 = vadd.f32 %v475_v33, %v471_v31 }
  0xc0   : > { %v300_v56 = vpop.xlane.xlu1 %299  ;;  %v444_v21 = vadd.f32 %v442_v41, %v438_v6  ;;  %v499_v51 = vadd.s32 4294967288, %v1151_v18 }
  0xc1   : > { %v334_v58 = vmul.f32 %v333_v62, %v300_v56  ;;  %v372_v36 = vmul.f32 %v371_v63, %v300_v56  ;;  %v297_v9 = vpop.xlane.xlu0 %296  ;;  %v410_v38 = vmul.f32 %v409_v0, %v300_v56  ;;  %v448_v40 = vmul.f32 %v447_v2, %v300_v56 }
  0xc2   : > { %v329_v39 = vmul.f32 %v327_v59, %v297_v9  ;;  %v367_v10 = vmul.f32 %v365_v60, %v297_v9  ;;  %v486_v11 = vmul.f32 %v485_v3, %v300_v56  ;;  %v405_v19 = vmul.f32 %v403_v61, %v297_v9  ;;  %v303_v22 = vpop.xlane.xlu2 %302 }
  0xc3   : > { %v336_v47 = vadd.f32 %v334_v58, %v330_v42  ;;  %v374_v20 = vadd.f32 %v372_v36, %v368_v45  ;;  %v482_v59 = vadd.f32 %v480_v37, %v476_v7  ;;  %v412_v49 = vadd.f32 %v410_v38, %v406_v53 }
  0xc4   : > { %v331_v50 = vadd.f32 %v329_v39, %v325_v48  ;;  %v443_v60 = vmul.f32 %v441_v4, %v297_v9  ;;  %v481_v23 = vmul.f32 %v479_v5, %v297_v9  ;;  %v450_v61 = vadd.f32 %v448_v40, %v444_v21 }
  0xc5   : > { %v369_v25 = vadd.f32 %v367_v10, %v363_v57  ;;  %v407_v26 = vadd.f32 %v405_v19, %v401_v44  ;;  %v488_v52 = vadd.f32 %v486_v11, %v482_v59  ;;  %v335_v28 = vmul.f32 %v333_v62, %v303_v22 }
  0xc6   : > { %v445_v24 = vadd.f32 %v443_v60, %v439_v46  ;;  %v483_v27 = vadd.f32 %v481_v23, %v477_v14  ;;  %v373_v4 = vmul.f32 %v371_v63, %v303_v22  ;;  %v411_v5 = vmul.f32 %v409_v0, %v303_v22 }
  0xc7   : > { %v449_v29 = vmul.f32 %v447_v2, %v303_v22  ;;  %v487_v30 = vmul.f32 %v485_v3, %v303_v22  ;;  %v340_v31 = vadd.f32 %v339_v12, %v336_v47  ;;  %v378_v54 = vadd.f32 %v377_v13, %v374_v20 }
  0xc8   : > { %v416_v62 = vadd.f32 %v415_v15, %v412_v49  ;;  %v337_v32 = vadd.f32 %v335_v28, %v331_v50  ;;  %v375_v63 = vadd.f32 %v373_v4, %v369_v25  ;;  %v413_v33 = vadd.f32 %v411_v5, %v407_v26 }
  0xc9   : > { %v451_v34 = vadd.f32 %v449_v29, %v445_v24  ;;  %v489_v0 = vadd.f32 %v487_v30, %v483_v27  ;;  %v454_v55 = vadd.f32 %v453_v16, %v450_v61  ;;  %v492_v1 = vadd.f32 %v491_v17, %v488_v52 }
  0xca   : > { %v341_v2 = vadd.f32 %v339_v12, %v337_v32  ;;  %v379_v3 = vadd.f32 %v377_v13, %v375_v63  ;;  %v417_v35 = vadd.f32 %v415_v15, %v413_v33  ;;  %v498_v6 = vperm.slane %v340_v31, %v1151_v18 }
  0xcb   : > { %v455_v43 = vadd.f32 %v453_v16, %v451_v34  ;;  %v493_v48 = vadd.f32 %v491_v17, %v489_v0  ;;  %v506_v7 = vperm.slane %v378_v54, %v1151_v18  ;;  %v512_v57 = vperm.slane %v416_v62, %v1151_v18 }
  0xcc   : > { %v500_v56 = vperm.slane %v341_v2, %v499_v51  ;;  %v507_v8 = vperm.slane %v379_v3, %v499_v51  ;;  %v513_v58 = vperm.slane %v417_v35, %v499_v51  ;;  %v518_v16 = vperm.slane %v454_v55, %v1151_v18 }
  0xcd   : > { %v519_v12 = vperm.slane %v455_v43, %v499_v51  ;;  %v525_v15 = vperm.slane %v493_v48, %v499_v51  ;;  %v524_v41 = vperm.slane %v492_v1, %v1151_v18 }
  0xce   : > { %v502_v13 = vsel %vm501_vm0, %v500_v56, %v498_v6  ;;  %v508_v17 = vsel %vm501_vm0, %v507_v8, %v506_v7  ;;  %v514_v36 = vsel %vm501_vm0, %v513_v58, %v512_v57 }
  0xcf   : > { %v529_v37 = vsel %vm528_vm1, %v502_v13, %v508_v17  ;;  %v520_v9 = vsel %vm501_vm0, %v519_v12, %v518_v16  ;;  %v526_v42 = vsel %vm501_vm0, %v525_v15, %v524_v41 }
  0xd0   : > { %v531_v38 = vsel %vm530_vm2, %v529_v37, %v514_v36 }
  0xd1   : > { %v533_v44 = vsel %vm532_vm3, %v531_v38, %v520_v9 }
  0xd2   : > { %v535_v39 = vsel %vm534_vm4, %v533_v44, %v526_v42 }
  0xd3   : > { %537 = vst.msk [vmem:[%s243_s13] sm:$0x1f] %vm536_vm5, %v535_v39 }
  0xd4 PF: > { %s1341_s14 = sld [smem:[#allocation15_spill]] }
  0xd5   : > { %s1342_s12 = sld [smem:[#allocation11_spill]] }
  0xd6   : > { %s1343_s13 = sld [smem:[#allocation12_spill]] }
  0xd7   : > { %s1345_s15 = sld [smem:[#allocation14_spill]] }
  0xd8   : > { %s1346_s16 = sld [smem:[#allocation16_spill]] }
  0xda   : > { %s18_s17 = sadd.s32 1, %s1341_s14   ;;  %s1344_s14 = sld [smem:[#allocation17_spill]] }
  0xdb   : > { %p15_p2 = scmp.ge.s32.totalorder %s18_s17, 4  }
  0xdd   :  { %17 = sbr.rel (!%p15_p2) target bundleno = 11 (0xb), region = 82 }
  0xe2   :  { %563 = vsyncpa [#allocation3], 1 }
  0xe3   :  { %565 = vsyncpa [#allocation3 + $0x1], 1 }
  0xe4   :  { %566 = vsyncpa [#allocation4], 1 }
  0xe5   :  { %568 = vsyncpa [#allocation4 + $0x1], 1 }
  0xe6   :  { %569 = vsyncpa [#allocation5], 1 }
  0xe7   :  { %571 = vsyncpa [#allocation5 + $0x1], 1 }

</bundles_post_ra>
